<compile_context>
chip_gen: v7x
topology: tpu7x:2x2x1
jax: 0.10.0
libtpu: 0.0.40
codegen_flags: <defaults>
</compile_context>

<pallas_src>
import collections

import jax
import jax.numpy as jnp
from jax.experimental import pallas as pl
from jax.experimental.pallas import tpu as pltpu


# ---------------------------------------------------------------------------
# Pallas kernels
# ---------------------------------------------------------------------------
def _fc_relu_resident_kernel(x_ref, w_ref, b_ref, o_ref):
    # x: (tm, K); w: (K, tn) pre-transposed; b: (1, tn).
    y = jnp.dot(x_ref[...], w_ref[...], preferred_element_type=jnp.float32)
    y = y + b_ref[...].astype(jnp.float32)
    o_ref[...] = jnp.maximum(y, 0.0).astype(o_ref.dtype)


def _fc_relu_tiled_kernel(x_ref, w_ref, b_ref, o_ref, acc_ref):
    # x: (tm, tk); w: (tk, tn); b: (1, tn); acc: (tm, tn) f32 scratch.
    k = pl.program_id(2)

    @pl.when(k == 0)
    def _():
        acc_ref[...] = jnp.zeros_like(acc_ref)

    acc_ref[...] += jnp.dot(x_ref[...], w_ref[...],
                            preferred_element_type=jnp.float32)

    @pl.when(k == pl.num_programs(2) - 1)
    def _():
        y = acc_ref[...] + b_ref[...].astype(jnp.float32)
        o_ref[...] = jnp.maximum(y, 0.0).astype(o_ref.dtype)


def _row_mean_kernel(x_ref, o_ref):
    # x: (tr, H*W) -> mean over last axis -> (tr, 1), accumulated in f32.
    x = x_ref[...].astype(jnp.float32)
    o_ref[...] = (jnp.sum(x, axis=-1, keepdims=True)
                  * (1.0 / x.shape[-1])).astype(o_ref.dtype)


# ---------------------------------------------------------------------------
# Helpers
# ---------------------------------------------------------------------------
def _round_up(x, m):
    return (x + m - 1) // m * m


def _largest_aligned_divisor(n, cap, align=128):
    """Largest multiple of `align` that divides `n` (n % align == 0) and <= cap."""
    cap = max(align, min(cap, n))
    best = align
    d = align
    while d <= cap:
        if n % d == 0:
            best = d
        d += align
    return best


def _vmem_capacity_bytes():
    """Physical VMEM per core; conservative (v7x-sized) fallback if unknown."""
    try:
        info = pltpu.get_tpu_info()
        cap = getattr(info, "vmem_capacity_bytes", None)
        if cap:
            return int(cap)
    except Exception:
        pass
    return 64 * 1024 * 1024


FC1Params = collections.namedtuple("FC1Params", ["w_kn", "b2d", "n_out", "k_in"])


def prepare_fc1_params(weight, bias, compute_dtype=None):
    """One-time parameter prep, hoisted off the hot path.

    Pads N and K to multiples of 128 (lane-dense stores, aligned K tiles) and
    transposes the PyTorch (N, K) weight to (K, N) so kernels run a canonical
    MXU matmul with no per-block transpose.
    """
    N, K = weight.shape
    Np, Kp = _round_up(N, 128), _round_up(K, 128)
    w = weight
    if (Np, Kp) != (N, K):
        w = jnp.pad(w, ((0, Np - N), (0, Kp - K)))
    w_kn = jnp.asarray(w.T)                       # (Kp, Np)
    b = bias if Np == N else jnp.pad(bias, (0, Np - N))
    if compute_dtype is not None:
        w_kn = w_kn.astype(compute_dtype)
    return FC1Params(w_kn=w_kn, b2d=b.reshape(1, Np), n_out=N, k_in=K)


# ---------------------------------------------------------------------------
# fc1 + ReLU wrappers
# ---------------------------------------------------------------------------
def _fc1_relu_resident(x2d, w_kn, b2d, out_dtype, *, vmem_limit):
    """M-tiled matmul with the whole (K, N) weight resident in VMEM."""
    M, K = x2d.shape
    Kw, Np = w_kn.shape
    assert Kw == K
    in_b = x2d.dtype.itemsize
    w_b = w_kn.dtype.itemsize
    out_b = jnp.dtype(out_dtype).itemsize
    weight_bytes = K * Np * w_b

    # Split N in two when a single M block covers the batch: keeps both v7x
    # TensorCores busy and halves per-core resident weight; on v5e/v6e (one
    # TC) the extra axis is just a short serial loop.
    n_blocks = 2 if (M <= 256 and Np >= 256 and Np % 256 == 0) else 1
    tn = Np // n_blocks

    # K-aware tm: resident weight + double-buffered (tm, K) input and (tm, tn)
    # output tiles must fit the VMEM limit (headroom for Mosaic scratch).
    wbuf = K * tn * w_b * (1 if n_blocks == 1 else 2)
    avail = max(vmem_limit - wbuf - (4 << 20), 1 << 20)
    per_row = 2 * (K * in_b + tn * out_b)
    tm = 512
    while tm > 8 and tm * per_row > avail:
        tm //= 2
    tm = max(tm, 8)
    if M <= tm:
        tm = M                                    # single full block

    grid = (pl.cdiv(M, tm), n_blocks)
    bytes_accessed = (x2d.size * in_b * n_blocks + weight_bytes
                      + b2d.size * b2d.dtype.itemsize + M * Np * out_b)
    cost = pl.CostEstimate(flops=2 * M * K * Np, transcendentals=0,
                           bytes_accessed=int(bytes_accessed))

    def build(single_buffer_invariant):
        def spec(shape, imap, invariant):
            if single_buffer_invariant and invariant:
                # Grid-invariant operand: a second pipeline buffer is pure
                # VMEM waste, so single-buffer it.
                return pl.BlockSpec(shape, imap, pipeline_mode=pl.Buffered(1))
            return pl.BlockSpec(shape, imap)

        return pl.pallas_call(
            _fc_relu_resident_kernel,
            out_shape=jax.ShapeDtypeStruct((M, Np), out_dtype),
            grid=grid,
            in_specs=[
                spec((tm, K), lambda i, j: (i, 0), grid[0] == 1),
                spec((K, tn), lambda i, j: (0, j), n_blocks == 1),
                spec((1, tn), lambda i, j: (0, j), n_blocks == 1),
            ],
            out_specs=pl.BlockSpec((tm, tn), lambda i, j: (i, j)),
            compiler_params=pltpu.CompilerParams(
                dimension_semantics=("parallel", "parallel"),
                vmem_limit_bytes=int(vmem_limit)),
            cost_estimate=cost,
        )

    try:
        return build(True)(x2d, w_kn, b2d)
    except Exception:
        # pl.Buffered(1) not supported on this jax version -> default buffering.
        return build(False)(x2d, w_kn, b2d)


def _fc1_relu_tiled(x2d, w_kn, b2d, out_dtype, *, vmem_limit):
    """(M, N, K)-tiled matmul with f32 accumulator for very large feature_num."""
    M, Kp = x2d.shape
    _, Np = w_kn.shape
    in_b = x2d.dtype.itemsize
    w_b = w_kn.dtype.itemsize
    out_b = jnp.dtype(out_dtype).itemsize

    tm = 512 if M >= 512 else _round_up(M, 8)
    tn = _largest_aligned_divisor(Np, 512)
    # Minimize K steps (fewer f32 accumulator round trips; MRB-friendly on v7x):
    # largest 128-aligned divisor of Kp whose double-buffered x/w tiles still
    # fit next to the accumulator, output tiles and bias.
    fixed = tm * tn * 4 + 2 * tm * tn * out_b + 2 * tn * 4 + (4 << 20)
    per_tk = 2 * (tm * in_b + tn * w_b)
    tk_cap = max(128, (vmem_limit - fixed) // per_tk)
    tk = _largest_aligned_divisor(Kp, tk_cap)

    grid = (pl.cdiv(M, tm), Np // tn, Kp // tk)
    bytes_accessed = (x2d.size * in_b * (Np // tn)
                      + Kp * Np * w_b + M * Np * out_b)
    return pl.pallas_call(
        _fc_relu_tiled_kernel,
        out_shape=jax.ShapeDtypeStruct((M, Np), out_dtype),
        grid_spec=pltpu.PrefetchScalarGridSpec(
            num_scalar_prefetch=0,
            grid=grid,
            in_specs=[
                pl.BlockSpec((tm, tk), lambda i, j, k: (i, k)),
                pl.BlockSpec((tk, tn), lambda i, j, k: (k, j)),
                pl.BlockSpec((1, tn), lambda i, j, k: (0, j)),
            ],
            out_specs=pl.BlockSpec((tm, tn), lambda i, j, k: (i, j)),
            scratch_shapes=[pltpu.VMEM((tm, tn), jnp.float32)],
        ),
        compiler_params=pltpu.CompilerParams(
            dimension_semantics=("parallel", "parallel", "arbitrary"),
            vmem_limit_bytes=int(vmem_limit)),
        cost_estimate=pl.CostEstimate(
            flops=2 * M * Kp * Np, transcendentals=0,
            bytes_accessed=int(bytes_accessed)),
    )(x2d, w_kn, b2d)


def _fc1_relu(x2d, w_kn, b2d, out_dtype, *, force_tiled=False):
    """y = relu(x2d @ w_kn + b); w_kn is the pre-transposed, pre-padded weight."""
    capacity = _vmem_capacity_bytes()
    vmem_limit = capacity * 3 // 4          # ~96 MiB on v5e/v6e, ~48 MiB on v7x
    resident_max = capacity * 3 // 8        # ~48 MiB on v5e/v6e, ~24 MiB on v7x
    weight_bytes = w_kn.size * w_kn.dtype.itemsize
    if force_tiled or weight_bytes > resident_max:
        return _fc1_relu_tiled(x2d, w_kn, b2d, out_dtype, vmem_limit=vmem_limit)
    return _fc1_relu_resident(x2d, w_kn, b2d, out_dtype, vmem_limit=vmem_limit)


# ---------------------------------------------------------------------------
# AdaptiveAvgPool2d((1, 1))
# ---------------------------------------------------------------------------
def _adaptive_avg_pool_1x1(x_nchw):
    """AdaptiveAvgPool2d((1,1)) on NCHW input via a row-tiled Pallas mean kernel."""
    N, C, H, W = x_nchw.shape
    R, L = N * C, H * W
    flat = x_nchw.reshape(R, L)

    # 6 MiB per pipeline buffer keeps two input buffers inside v5e's 16 MiB
    # default scoped VMEM; explicit vmem_limit below is safe on all generations.
    budget = 6 * 1024 * 1024
    bytes_per_row = L * flat.dtype.itemsize
    tr = max(8, min(512, (budget // max(bytes_per_row, 1)) // 8 * 8))
    if R <= tr:
        tr = R

    # TODO(synk): if this path ever matters for real C/H/W, put channels on the
    # lane axis (lane-dense output) and chunk L with a scratch accumulator.
    pooled = pl.pallas_call(
        _row_mean_kernel,
        out_shape=jax.ShapeDtypeStruct((R, 1), x_nchw.dtype),
        grid=(pl.cdiv(R, tr),),
        in_specs=[pl.BlockSpec((tr, L), lambda i: (i, 0))],
        out_specs=pl.BlockSpec((tr, 1), lambda i: (i, 0)),
        compiler_params=pltpu.CompilerParams(
            dimension_semantics=("parallel",),
            vmem_limit_bytes=16 * 1024 * 1024),
    )(flat)
    return pooled.reshape(N, C, 1, 1)


# ---------------------------------------------------------------------------
# Forward
# ---------------------------------------------------------------------------
def benchmark_mlp_forward(x, params, avg_pool=False, *, compute_dtype=None,
                          force_tiled=False):
    """Mirrors BenchMarkMLP.forward; returns a 1-tuple like the PyTorch module.

    `params` is either an FC1Params (from prepare_fc1_params; preferred, since
    padding and the one-time (K, N) transpose are hoisted off the hot path) or
    a raw (weight, bias) pair in PyTorch (N, K) layout.
    `compute_dtype=jnp.bfloat16` enables the bf16 MXU path (f32 accumulation).
    """
    if not isinstance(params, FC1Params):
        weight, bias = params
        params = prepare_fc1_params(weight, bias, compute_dtype=compute_dtype)

    if avg_pool:
        # As in PyTorch, fc1 then acts on the trailing dim of size 1, which only
        # type-checks when feature_num == 1.
        x = _adaptive_avg_pool_1x1(x)

    lead = x.shape[:-1]
    K = x.shape[-1]
    if K != params.k_in:
        raise ValueError(f"last dim {K} != feature_num {params.k_in}")

    out_dtype = x.dtype
    x2d = x.reshape(-1, K)
    w_kn = params.w_kn
    if compute_dtype is not None:
        x2d = x2d.astype(compute_dtype)
        if w_kn.dtype != jnp.dtype(compute_dtype):
            w_kn = w_kn.astype(compute_dtype)

    Kp, Np = w_kn.shape
    if Kp != K:
        # Only when feature_num is not 128-aligned; zero columns contribute nothing.
        x2d = jnp.pad(x2d, ((0, 0), (0, Kp - K)))

    y = _fc1_relu(x2d, w_kn, params.b2d, out_dtype, force_tiled=force_tiled)
    if Np != params.n_out:
        y = y[:, :params.n_out]
    return (y.reshape(*lead, params.n_out),)


# ---------------------------------------------------------------------------
# Deterministic parameter init (matches init_weights: kaiming_normal fan_out/relu
# for the Linear weight; PyTorch-default uniform bias).
# ---------------------------------------------------------------------------
def init_params(key, feature_num, dtype=jnp.float32):
    k_w, k_b = jax.random.split(key)
    fan_out = feature_num
    std = (2.0 / fan_out) ** 0.5
    weight = std * jax.random.normal(k_w, (feature_num, feature_num), dtype=dtype)
    bound = 1.0 / (feature_num ** 0.5)
    bias = jax.random.uniform(k_b, (feature_num,), dtype=dtype,
                              minval=-bound, maxval=bound)
    return weight, bias


if __name__ == "__main__":
    key = jax.random.PRNGKey(0)
    k_x, k_p, k_x2, k_p2, k_pool = jax.random.split(key, 5)

    # 1) Default path (resident-weight, M-tiled, single-buffered invariants).
    feature_num, batch = 128, 8
    weight, bias = init_params(k_p, feature_num)
    params = prepare_fc1_params(weight, bias)           # prep hoisted off hot path
    x = jax.random.normal(k_x, (batch, feature_num), dtype=jnp.float32)
    (y,) = benchmark_mlp_forward(x, params)
    y = jax.block_until_ready(y)
    ref = jnp.maximum(x @ weight.T + bias, 0.0)
    assert y.shape == (batch, feature_num)
    assert jnp.allclose(y, ref, atol=1e-5, rtol=1e-5)

    # 2) Resident path with the extra parallel-N axis (Np % 256 == 0, single M block).
    f2 = 256
    w2, b2 = init_params(k_p2, f2)
    params2 = prepare_fc1_params(w2, b2)
    x2 = jax.random.normal(k_x2, (8, f2), dtype=jnp.float32)
    (y2,) = benchmark_mlp_forward(x2, params2)
    y2 = jax.block_until_ready(y2)
    ref2 = jnp.maximum(x2 @ w2.T + b2, 0.0)
    assert jnp.allclose(y2, ref2, atol=1e-5, rtol=1e-5)

    # 3) Exercise the (M, N, K)-tiled fallback path explicitly.
    (y3,) = benchmark_mlp_forward(x2, params2, force_tiled=True)
    y3 = jax.block_until_ready(y3)
    assert jnp.allclose(y3, ref2, atol=1e-5, rtol=1e-5)

    # 4) bf16 compute path (f32 accumulation), gated behind compute_dtype.
    params_bf16 = prepare_fc1_params(weight, bias, compute_dtype=jnp.bfloat16)
    (y4,) = benchmark_mlp_forward(x, params_bf16, compute_dtype=jnp.bfloat16)
    y4 = jax.block_until_ready(y4)
    assert y4.dtype == x.dtype
    assert jnp.allclose(y4, ref, atol=1e-1, rtol=1e-1)

    # 5) avg_pool path (composes with fc1 only when feature_num == 1, as in PyTorch).
    xp = jax.random.normal(k_pool, (2, 4, 16, 16), dtype=jnp.float32)
    wp, bp = init_params(k_p, 1)
    params_p = prepare_fc1_params(wp, bp)
    (yp,) = benchmark_mlp_forward(xp, params_p, avg_pool=True)
    yp = jax.block_until_ready(yp)
    pooled_ref = jnp.mean(xp, axis=(2, 3), keepdims=True)
    refp = jnp.maximum(pooled_ref * wp[0, 0] + bp[0], 0.0)
    assert yp.shape == (2, 4, 1, 1)
    assert jnp.allclose(yp, refp, atol=1e-5, rtol=1e-5)

    print("KERNEL_OK")
</pallas_src>

<mosaic_0001>
module attributes {stable_mosaic.version = 11 : i64} {
  func.func @_fc_relu_resident_kernel(%arg0: i32, %arg1: i32, %arg2: memref<8x128xf32, #tpu.memory_space<vmem>>, %arg3: memref<128x128xf32, #tpu.memory_space<vmem>>, %arg4: memref<1x128xf32, #tpu.memory_space<vmem>>, %arg5: memref<8x128xf32, #tpu.memory_space<vmem>>) attributes {dimension_semantics = [#tpu.dimension_semantics<parallel>, #tpu.dimension_semantics<parallel>], iteration_bounds = array<i64: 1, 1>, scalar_prefetch = 0 : i64, scratch_operands = 0 : i64, tpu.core_type = #tpu.core_type<tc>, window_params = [{pipeline_mode = #tpu.pipeline_mode<synchronous>, transform_indices = @transform_0, window_bounds = array<i64: 8, 128>}, {pipeline_mode = #tpu.pipeline_mode<synchronous>, transform_indices = @transform_1, window_bounds = array<i64: 128, 128>}, {pipeline_mode = #tpu.pipeline_mode<synchronous>, transform_indices = @transform_2, window_bounds = array<i64: 1, 128>}, {transform_indices = @transform_3, window_bounds = array<i64: 8, 128>}]} {
    %c0 = arith.constant 0 : index
    %c0_0 = arith.constant 0 : index
    %0 = vector.load %arg2[%c0, %c0_0] : memref<8x128xf32, #tpu.memory_space<vmem>>, vector<8x128xf32>
    %c0_1 = arith.constant 0 : index
    %c0_2 = arith.constant 0 : index
    %1 = vector.load %arg3[%c0_1, %c0_2] : memref<128x128xf32, #tpu.memory_space<vmem>>, vector<128x128xf32>
    %cst = arith.constant dense<0.000000e+00> : vector<8x128xf32>
    %2 = tpu.matmul %0, %1, %cst {dimension_numbers = #tpu.dot_dimension_numbers<[1], [0], [0], [1], [0, 0, 1, 1], [], []>} : vector<8x128xf32>, vector<128x128xf32>, vector<8x128xf32> -> vector<8x128xf32>
    %c0_3 = arith.constant 0 : index
    %c0_4 = arith.constant 0 : index
    %3 = vector.load %arg4[%c0_3, %c0_4] : memref<1x128xf32, #tpu.memory_space<vmem>>, vector<1x128xf32>
    %4 = vector.broadcast %3 : vector<1x128xf32> to vector<8x128xf32>
    %5 = arith.addf %2, %4 : vector<8x128xf32>
    %cst_5 = arith.constant 0.000000e+00 : f32
    %6 = vector.broadcast %cst_5 : f32 to vector<8x128xf32>
    %7 = arith.maximumf %5, %6 : vector<8x128xf32>
    %c0_6 = arith.constant 0 : index
    %c0_7 = arith.constant 0 : index
    %8 = vector.load %arg5[%c0_6, %c0_7] : memref<8x128xf32, #tpu.memory_space<vmem>>, vector<8x128xf32>
    tpu.vector_store %arg5[%c0_6, %c0_7], %7 {strides = array<i32>} : memref<8x128xf32, #tpu.memory_space<vmem>>, vector<8x128xf32>,
    return
  }
  func.func @transform_0(%arg0: i32, %arg1: i32) -> (i32, i32) {
    %c0_i32 = arith.constant 0 : i32
    %c0_i32_0 = arith.constant 0 : i32
    return %arg0, %c0_i32 : i32, i32
  }
  func.func @transform_1(%arg0: i32, %arg1: i32) -> (i32, i32) {
    %c0_i32 = arith.constant 0 : i32
    %c0_i32_0 = arith.constant 0 : i32
    return %c0_i32, %arg1 : i32, i32
  }
  func.func @transform_2(%arg0: i32, %arg1: i32) -> (i32, i32) {
    %c0_i32 = arith.constant 0 : i32
    %c0_i32_0 = arith.constant 0 : i32
    return %c0_i32, %arg1 : i32, i32
  }
  func.func @transform_3(%arg0: i32, %arg1: i32) -> (i32, i32) {
    %c0_i32 = arith.constant 0 : i32
    return %arg0, %arg1 : i32, i32
  }
}

module attributes {stable_mosaic.version = 11 : i64} {
  func.func @_fc_relu_resident_kernel(%arg0: i32, %arg1: i32, %arg2: memref<8x128xf32, #tpu.memory_space<vmem>>, %arg3: memref<128x128xf32, #tpu.memory_space<vmem>>, %arg4: memref<1x128xf32, #tpu.memory_space<vmem>>, %arg5: memref<8x128xf32, #tpu.memory_space<vmem>>) attributes {dimension_semantics = [#tpu.dimension_semantics<parallel>, #tpu.dimension_semantics<parallel>], iteration_bounds = array<i64: 1, 1>, scalar_prefetch = 0 : i64, scratch_operands = 0 : i64, tpu.core_type = #tpu.core_type<tc>, window_params = [{transform_indices = @transform_0, window_bounds = array<i64: 8, 128>}, {transform_indices = @transform_1, window_bounds = array<i64: 128, 128>}, {transform_indices = @transform_2, window_bounds = array<i64: 1, 128>}, {transform_indices = @transform_3, window_bounds = array<i64: 8, 128>}]} {
    %c0 = arith.constant 0 : index
    %c0_0 = arith.constant 0 : index
    %0 = vector.load %arg2[%c0, %c0_0] : memref<8x128xf32, #tpu.memory_space<vmem>>, vector<8x128xf32>
    %c0_1 = arith.constant 0 : index
    %c0_2 = arith.constant 0 : index
    %1 = vector.load %arg3[%c0_1, %c0_2] : memref<128x128xf32, #tpu.memory_space<vmem>>, vector<128x128xf32>
    %cst = arith.constant dense<0.000000e+00> : vector<8x128xf32>
    %2 = tpu.matmul %0, %1, %cst {dimension_numbers = #tpu.dot_dimension_numbers<[1], [0], [0], [1], [0, 0, 1, 1], [], []>} : vector<8x128xf32>, vector<128x128xf32>, vector<8x128xf32> -> vector<8x128xf32>
    %c0_3 = arith.constant 0 : index
    %c0_4 = arith.constant 0 : index
    %3 = vector.load %arg4[%c0_3, %c0_4] : memref<1x128xf32, #tpu.memory_space<vmem>>, vector<1x128xf32>
    %4 = vector.broadcast %3 : vector<1x128xf32> to vector<8x128xf32>
    %5 = arith.addf %2, %4 : vector<8x128xf32>
    %cst_5 = arith.constant 0.000000e+00 : f32
    %6 = vector.broadcast %cst_5 : f32 to vector<8x128xf32>
    %7 = arith.maximumf %5, %6 : vector<8x128xf32>
    %c0_6 = arith.constant 0 : index
    %c0_7 = arith.constant 0 : index
    %8 = vector.load %arg5[%c0_6, %c0_7] : memref<8x128xf32, #tpu.memory_space<vmem>>, vector<8x128xf32>
    tpu.vector_store %arg5[%c0_6, %c0_7], %7 {strides = array<i32>} : memref<8x128xf32, #tpu.memory_space<vmem>>, vector<8x128xf32>,
    return
  }
  func.func @transform_0(%arg0: i32, %arg1: i32) -> (i32, i32) {
    %c0_i32 = arith.constant 0 : i32
    %c0_i32_0 = arith.constant 0 : i32
    return %arg0, %c0_i32 : i32, i32
  }
  func.func @transform_1(%arg0: i32, %arg1: i32) -> (i32, i32) {
    %c0_i32 = arith.constant 0 : i32
    %c0_i32_0 = arith.constant 0 : i32
    return %c0_i32, %arg1 : i32, i32
  }
  func.func @transform_2(%arg0: i32, %arg1: i32) -> (i32, i32) {
    %c0_i32 = arith.constant 0 : i32
    %c0_i32_0 = arith.constant 0 : i32
    return %c0_i32, %arg1 : i32, i32
  }
  func.func @transform_3(%arg0: i32, %arg1: i32) -> (i32, i32) {
    %c0_i32 = arith.constant 0 : i32
    return %arg0, %arg1 : i32, i32
  }
}

</mosaic_0001>

<bundles_post_ra>
// kernel: tpu_custom_call.1
= control target key start
LH: loop header
LB: loop body
LE: loop exit
PB: predicated region body
PF: predicated region fallthrough
CT: control target
= control target key end

     0   :  { %8 = vsyncpa [#allocation3], 0  ;;  %s384_s0 = inlined_call_operand.hbm [shape: f32[8,128], index: 0, kind: input, shape index: {}]   ;;  %s385_s1 = inlined_call_operand.hbm [shape: f32[128,128], index: 1, kind: input, shape index: {}]   ;;  %s386_s2 = inlined_call_operand.vmem [shape: f32[1,128], index: 2, kind: input, shape index: {}]   ;;  %s387_s3 = inlined_call_operand.hbm [shape: f32[8,128], index: 3, kind: output, shape index: {}]  }
   0x1   :  { %9 = vsyncpa [#allocation6], 0 }
   0x2   :  { %10 = vsyncpa [#allocation4], 0  ;;  %s310_s12 = smov [#allocation2]   ;;  %s311_s14 = smov [#allocation5]  }
   0x3   :  { %s17_s13 = sshll.u32 %s310_s12, 4  ;;  %s26_s15 = sshll.u32 %s311_s14, 4  ;;  %s18_s13 = int_to_ptr.vmem [resolvable:$true] %s17_s13  ;;  %s338_s15 = int_to_ptr.vmem [resolvable:$true] %s26_s15 }
   0x4   :  { %s238_s18 = scalar_lea.hbm %s384_s0, 128 }
   0x5   :  { %p239_p0 = scmp.ne.s32.totalorder %s384_s0, %s238_s18  ;;  %p242_p1 = scmp.lt.u32.totalorder %s238_s18, %s384_s0 }
   0x7   :  { %p244_p2 = pnand %p242_p1, %p239_p0 }
   0x9   :  { %247 = shalt.err (!%p244_p2)
}
   0xa   :  { %s248_s23 = scalar_lea.vmem %s18_s13, 128  ;;  %p253_p4 = scmp.lt.s32.totalorder %s18_s13, %s18_s13 }
   0xb   :  { %p249_p3 = scmp.ne.s32.totalorder %s18_s13, %s248_s23  ;;  %p254_p5 = scmp.lt.s32.totalorder %s248_s23, %s248_s23 }
   0xd   :  { %p255_p6 = por %p254_p5, %p253_p4 }
   0xf   :  { %p256_p7 = pnand %p255_p6, %p249_p3 }
  0x11   :  { %259 = shalt.err (!%p256_p7)
}
  0x12   :  { %20 = dma.hbm_to_vmem [thread:$0]  %s384_s0, 128, %s18_s13, [#allocation3]  }
  0x13   :  { %s260_s28 = scalar_lea.hbm %s385_s1, 2048 }
  0x14   :  { %p261_p8 = scmp.ne.s32.totalorder %s385_s1, %s260_s28  ;;  %p264_p9 = scmp.lt.u32.totalorder %s260_s28, %s385_s1 }
  0x16   :  { %p266_p10 = pnand %p264_p9, %p261_p8 }
  0x18   :  { %269 = shalt.err (!%p266_p10)
}
  0x19   :  { %s270_s6 = scalar_lea.vmem %s338_s15, 2048  ;;  %p275_p12 = scmp.lt.s32.totalorder %s338_s15, %s338_s15 }
  0x1a   :  { %p271_p11 = scmp.ne.s32.totalorder %s338_s15, %s270_s6  ;;  %p276_p13 = scmp.lt.s32.totalorder %s270_s6, %s270_s6 }
  0x1c   :  { %p277_p0 = por %p276_p13, %p275_p12 }
  0x1e   :  { %p278_p1 = pnand %p277_p0, %p271_p11 }
  0x20   :  { %281 = shalt.err (!%p278_p1)
}
  0x21   :  { %s312_s0 = smov 128   ;;  %s313_s7 = smov 8  }
  0x22   :  { %32 = dma.hbm_to_vmem [thread:$0]  %s385_s1, 2048, %s338_s15, [#allocation6], %s312_s0, %s312_s0, %s313_s7  }
  0x23   :  { %304 = dma.done.wait [#allocation3], 128  }
  0x24   :  { %305 = vsyncadd [#allocation3], 4294967168 }
  0x25   :  { %306 = dma.done.wait [#allocation6], 2048  }
  0x26   :  { %307 = vsyncadd [#allocation6], 4294965248  ;;  %v314_v0 = vmov 0.0|0.0   ;;  %vm315_vm0 = vmmov 0   ;;  %v316_v1 = vmov 0.0   ;;  %v42_v2 = vld [vmem:[#allocation5] sm:$0xff] }
  0x27   :  { %206 = vmatprep.subr.bf16.mxu0 %v314_v0  ;;  %203 = vmatprep.mubr.msk.f32.mxu0 %vm315_vm0, %v316_v1  ;;  %v43_v3 = vld [vmem:[#allocation5 + $0x8] sm:$0xff]  ;;  %v44_v4 = vld [vmem:[#allocation5 + $0x10] sm:$0xff]  ;;  %v45_v6 = vld [vmem:[#allocation5 + $0x18] sm:$0xff]  ;;  %s317_s11 = smov [#allocation7]  }
  0x28   :  { %v207_v5 = vpack.c.bf16 %v43_v3, %v42_v2  ;;  %v210_v7 = vpack.c.bf16 %v45_v6, %v44_v4  ;;  %v46_v8 = vld [vmem:[#allocation5 + $0x20] sm:$0xff]  ;;  %v47_v9 = vld [vmem:[#allocation5 + $0x28] sm:$0xff]  ;;  %v48_v11 = vld [vmem:[#allocation5 + $0x30] sm:$0xff]  ;;  %s143_s12 = sshll.u32 %s317_s11, 4  ;;  %s144_s12 = int_to_ptr.vmem [resolvable:$true] %s143_s12 }
  0x29   :  { %v213_v10 = vpack.c.bf16 %v47_v9, %v46_v8  ;;  %v49_v12 = vld [vmem:[#allocation5 + $0x38] sm:$0xff]  ;;  %v50_v14 = vld [vmem:[#allocation5 + $0x40] sm:$0xff]  ;;  %v51_v15 = vld [vmem:[#allocation5 + $0x48] sm:$0xff]  ;;  %s282_s13 = scalar_lea.vmem %s144_s12, 128  ;;  %p287_p3 = scmp.lt.s32.totalorder %s144_s12, %s144_s12 }
  0x2a   :  { %208 = vmatpush3.bf16.msra.mxu0 %v207_v5  ;;  %v216_v13 = vpack.c.bf16 %v49_v12, %v48_v11  ;;  %v219_v16 = vpack.c.bf16 %v51_v15, %v50_v14  ;;  %v52_v17 = vld [vmem:[#allocation5 + $0x50] sm:$0xff]  ;;  %v53_v18 = vld [vmem:[#allocation5 + $0x58] sm:$0xff]  ;;  %v54_v20 = vld [vmem:[#allocation5 + $0x60] sm:$0xff]  ;;  %p283_p2 = scmp.ne.s32.totalorder %s144_s12, %s282_s13  ;;  %p288_p4 = scmp.lt.s32.totalorder %s282_s13, %s282_s13 }
  0x2b   :  { %209 = vmatprep.subr.bf16.mxu0 %v314_v0  ;;  %v222_v19 = vpack.c.bf16 %v53_v18, %v52_v17  ;;  %v55_v21 = vld [vmem:[#allocation5 + $0x68] sm:$0xff]  ;;  %v56_v23 = vld [vmem:[#allocation5 + $0x70] sm:$0xff]  ;;  %v57_v24 = vld [vmem:[#allocation5 + $0x78] sm:$0xff] }
  0x2c   :  { %v225_v22 = vpack.c.bf16 %v55_v21, %v54_v20  ;;  %v228_v25 = vpack.c.bf16 %v57_v24, %v56_v23  ;;  %v41_v26 = vld [vmem:[#allocation2] sm:$0xff]  ;;  %p289_p5 = por %p288_p4, %p287_p3 }
  0x2d   :  { %v153_v27 = vld [vmem:[%s386_s2] ss:$0 sm:$0xff] }
  0x2e   :  { %211 = vmatpush3.bf16.msra.mxu0 %v210_v7  ;;  %p290_p6 = pnand %p289_p5, %p283_p2 }
  0x2f   :  { %212 = vmatprep.subr.bf16.mxu0 %v314_v0 }
  0x32   :  { %214 = vmatpush3.bf16.msra.mxu0 %v213_v10 }
  0x33   :  { %215 = vmatprep.subr.bf16.mxu0 %v314_v0 }
  0x36   :  { %217 = vmatpush3.bf16.msra.mxu0 %v216_v13 }
  0x37   :  { %218 = vmatprep.subr.bf16.mxu0 %v314_v0 }
  0x3a   :  { %220 = vmatpush3.bf16.msra.mxu0 %v219_v16 }
  0x3b   :  { %221 = vmatprep.subr.bf16.mxu0 %v314_v0 }
  0x3e   :  { %223 = vmatpush3.bf16.msra.mxu0 %v222_v19 }
  0x3f   :  { %224 = vmatprep.subr.bf16.mxu0 %v314_v0 }
  0x42   :  { %226 = vmatpush3.bf16.msra.mxu0 %v225_v22 }
  0x43   :  { %227 = vmatprep.subr.bf16.mxu0 %v314_v0 }
  0x46   :  { %229 = vmatpush3.bf16.msra.mxu0 %v228_v25 }
  0x49   :  { %204 = vmatmul.mubr.f32.vlgmr.msra.gmra.mrb[0].mxu0 %v41_v26 }
 0x11c   :  { %v131_v28 = vpop.f32.mrb[0].mxu0 }
 0x11d   :  { %v132_v29 = vadd.f32 %v153_v27, %v131_v28  ;;  %v205_v30 = vpop.f32.mrb[1].mxu0 }
 0x11f   :  { %v135_v31 = vmax.f32 %v132_v29, 0.0 }
 0x121   :  { %136 = vst [vmem:[#allocation7] sm:$0xff] %v135_v31 }
 0x122   :  { %293 = shalt.err (!%p290_p6)
}
 0x123   :  { %s294_s16 = scalar_lea.hbm %s387_s3, 128 }
 0x124   :  { %p295_p7 = scmp.ne.s32.totalorder %s387_s3, %s294_s16  ;;  %p298_p8 = scmp.lt.u32.totalorder %s294_s16, %s387_s3 }
 0x126   :  { %p300_p9 = pnand %p298_p8, %p295_p7 }
 0x128   :  { %303 = shalt.err (!%p300_p9)
}
 0x129   :  { %146 = dma.vmem_to_hbm [thread:$0]  %s144_s12, 128, %s387_s3, [#allocation4]  }
 0x12a   :  { %308 = dma.done.wait [#allocation4], 128  }
 0x12b   :  { %309 = vsyncadd [#allocation4], 4294967168 }
 0x12c   :  { %150 = vsyncpa [#allocation3], 1 }
 0x12d   :  { %151 = vsyncpa [#allocation6], 1 }
 0x12e   :  { %152 = vsyncpa [#allocation4], 1 }

// kernel: tpu_custom_call.1
= control target key start
LH: loop header
LB: loop body
LE: loop exit
PB: predicated region body
PF: predicated region fallthrough
CT: control target
= control target key end

     0   :  { %8 = vsyncpa [#allocation3], 0  ;;  %s384_s0 = inlined_call_operand.hbm [shape: f32[8,128], index: 0, kind: input, shape index: {}]   ;;  %s385_s1 = inlined_call_operand.hbm [shape: f32[128,128], index: 1, kind: input, shape index: {}]   ;;  %s386_s2 = inlined_call_operand.vmem [shape: f32[1,128], index: 2, kind: input, shape index: {}]   ;;  %s387_s3 = inlined_call_operand.hbm [shape: f32[8,128], index: 3, kind: output, shape index: {}]  }
   0x1   :  { %9 = vsyncpa [#allocation6], 0 }
   0x2   :  { %10 = vsyncpa [#allocation4], 0  ;;  %s310_s12 = smov [#allocation2]   ;;  %s311_s14 = smov [#allocation5]  }
   0x3   :  { %s17_s13 = sshll.u32 %s310_s12, 4  ;;  %s26_s15 = sshll.u32 %s311_s14, 4  ;;  %s18_s13 = int_to_ptr.vmem [resolvable:$true] %s17_s13  ;;  %s338_s15 = int_to_ptr.vmem [resolvable:$true] %s26_s15 }
   0x4   :  { %s238_s18 = scalar_lea.hbm %s384_s0, 128 }
   0x5   :  { %p239_p0 = scmp.ne.s32.totalorder %s384_s0, %s238_s18  ;;  %p242_p1 = scmp.lt.u32.totalorder %s238_s18, %s384_s0 }
   0x7   :  { %p244_p2 = pnand %p242_p1, %p239_p0 }
   0x9   :  { %247 = shalt.err (!%p244_p2)
}
   0xa   :  { %s248_s23 = scalar_lea.vmem %s18_s13, 128  ;;  %p253_p4 = scmp.lt.s32.totalorder %s18_s13, %s18_s13 }
   0xb   :  { %p249_p3 = scmp.ne.s32.totalorder %s18_s13, %s248_s23  ;;  %p254_p5 = scmp.lt.s32.totalorder %s248_s23, %s248_s23 }
   0xd   :  { %p255_p6 = por %p254_p5, %p253_p4 }
   0xf   :  { %p256_p7 = pnand %p255_p6, %p249_p3 }
  0x11   :  { %259 = shalt.err (!%p256_p7)
}
  0x12   :  { %20 = dma.hbm_to_vmem [thread:$0]  %s384_s0, 128, %s18_s13, [#allocation3]  }
  0x13   :  { %s260_s28 = scalar_lea.hbm %s385_s1, 2048 }
  0x14   :  { %p261_p8 = scmp.ne.s32.totalorder %s385_s1, %s260_s28  ;;  %p264_p9 = scmp.lt.u32.totalorder %s260_s28, %s385_s1 }
  0x16   :  { %p266_p10 = pnand %p264_p9, %p261_p8 }
  0x18   :  { %269 = shalt.err (!%p266_p10)
}
  0x19   :  { %s270_s6 = scalar_lea.vmem %s338_s15, 2048  ;;  %p275_p12 = scmp.lt.s32.totalorder %s338_s15, %s338_s15 }
  0x1a   :  { %p271_p11 = scmp.ne.s32.totalorder %s338_s15, %s270_s6  ;;  %p276_p13 = scmp.lt.s32.totalorder %s270_s6, %s270_s6 }
  0x1c   :  { %p277_p0 = por %p276_p13, %p275_p12 }
  0x1e   :  { %p278_p1 = pnand %p277_p0, %p271_p11 }
  0x20   :  { %281 = shalt.err (!%p278_p1)
}
  0x21   :  { %s312_s0 = smov 128   ;;  %s313_s7 = smov 8  }
  0x22   :  { %32 = dma.hbm_to_vmem [thread:$0]  %s385_s1, 2048, %s338_s15, [#allocation6], %s312_s0, %s312_s0, %s313_s7  }
  0x23   :  { %304 = dma.done.wait [#allocation3], 128  }
  0x24   :  { %305 = vsyncadd [#allocation3], 4294967168 }
  0x25   :  { %306 = dma.done.wait [#allocation6], 2048  }
  0x26   :  { %307 = vsyncadd [#allocation6], 4294965248  ;;  %v314_v0 = vmov 0.0|0.0   ;;  %vm315_vm0 = vmmov 0   ;;  %v316_v1 = vmov 0.0   ;;  %v42_v2 = vld [vmem:[#allocation5] sm:$0xff] }
  0x27   :  { %206 = vmatprep.subr.bf16.mxu0 %v314_v0  ;;  %203 = vmatprep.mubr.msk.f32.mxu0 %vm315_vm0, %v316_v1  ;;  %v43_v3 = vld [vmem:[#allocation5 + $0x8] sm:$0xff]  ;;  %v44_v4 = vld [vmem:[#allocation5 + $0x10] sm:$0xff]  ;;  %v45_v6 = vld [vmem:[#allocation5 + $0x18] sm:$0xff]  ;;  %s317_s11 = smov [#allocation7]  }
  0x28   :  { %v207_v5 = vpack.c.bf16 %v43_v3, %v42_v2  ;;  %v210_v7 = vpack.c.bf16 %v45_v6, %v44_v4  ;;  %v46_v8 = vld [vmem:[#allocation5 + $0x20] sm:$0xff]  ;;  %v47_v9 = vld [vmem:[#allocation5 + $0x28] sm:$0xff]  ;;  %v48_v11 = vld [vmem:[#allocation5 + $0x30] sm:$0xff]  ;;  %s143_s12 = sshll.u32 %s317_s11, 4  ;;  %s144_s12 = int_to_ptr.vmem [resolvable:$true] %s143_s12 }
  0x29   :  { %v213_v10 = vpack.c.bf16 %v47_v9, %v46_v8  ;;  %v49_v12 = vld [vmem:[#allocation5 + $0x38] sm:$0xff]  ;;  %v50_v14 = vld [vmem:[#allocation5 + $0x40] sm:$0xff]  ;;  %v51_v15 = vld [vmem:[#allocation5 + $0x48] sm:$0xff]  ;;  %s282_s13 = scalar_lea.vmem %s144_s12, 128  ;;  %p287_p3 = scmp.lt.s32.totalorder %s144_s12, %s144_s12 }
  0x2a   :  { %208 = vmatpush3.bf16.msra.mxu0 %v207_v5  ;;  %v216_v13 = vpack.c.bf16 %v49_v12, %v48_v11  ;;  %v219_v16 = vpack.c.bf16 %v51_v15, %v50_v14  ;;  %v52_v17 = vld [vmem:[#allocation5 + $0x50] sm:$0xff]  ;;  %v53_v18 = vld [vmem:[#allocation5 + $0x58] sm:$0xff]  ;;  %v54_v20 = vld [vmem:[#allocation5 + $0x60] sm:$0xff]  ;;  %p283_p2 = scmp.ne.s32.totalorder %s144_s12, %s282_s13  ;;  %p288_p4 = scmp.lt.s32.totalorder %s282_s13, %s282_s13 }
  0x2b   :  { %209 = vmatprep.subr.bf16.mxu0 %v314_v0  ;;  %v222_v19 = vpack.c.bf16 %v53_v18, %v52_v17  ;;  %v55_v21 = vld [vmem:[#allocation5 + $0x68] sm:$0xff]  ;;  %v56_v23 = vld [vmem:[#allocation5 + $0x70] sm:$0xff]  ;;  %v57_v24 = vld [vmem:[#allocation5 + $0x78] sm:$0xff] }
  0x2c   :  { %v225_v22 = vpack.c.bf16 %v55_v21, %v54_v20  ;;  %v228_v25 = vpack.c.bf16 %v57_v24, %v56_v23  ;;  %v41_v26 = vld [vmem:[#allocation2] sm:$0xff]  ;;  %p289_p5 = por %p288_p4, %p287_p3 }
  0x2d   :  { %v153_v27 = vld [vmem:[%s386_s2] ss:$0 sm:$0xff] }
  0x2e   :  { %211 = vmatpush3.bf16.msra.mxu0 %v210_v7  ;;  %p290_p6 = pnand %p289_p5, %p283_p2 }
  0x2f   :  { %212 = vmatprep.subr.bf16.mxu0 %v314_v0 }
  0x32   :  { %214 = vmatpush3.bf16.msra.mxu0 %v213_v10 }
  0x33   :  { %215 = vmatprep.subr.bf16.mxu0 %v314_v0 }
  0x36   :  { %217 = vmatpush3.bf16.msra.mxu0 %v216_v13 }
  0x37   :  { %218 = vmatprep.subr.bf16.mxu0 %v314_v0 }
  0x3a   :  { %220 = vmatpush3.bf16.msra.mxu0 %v219_v16 }
  0x3b   :  { %221 = vmatprep.subr.bf16.mxu0 %v314_v0 }
  0x3e   :  { %223 = vmatpush3.bf16.msra.mxu0 %v222_v19 }
  0x3f   :  { %224 = vmatprep.subr.bf16.mxu0 %v314_v0 }
  0x42   :  { %226 = vmatpush3.bf16.msra.mxu0 %v225_v22 }
  0x43   :  { %227 = vmatprep.subr.bf16.mxu0 %v314_v0 }
  0x46   :  { %229 = vmatpush3.bf16.msra.mxu0 %v228_v25 }
  0x49   :  { %204 = vmatmul.mubr.f32.vlgmr.msra.gmra.mrb[0].mxu0 %v41_v26 }
 0x11c   :  { %v131_v28 = vpop.f32.mrb[0].mxu0 }
 0x11d   :  { %v132_v29 = vadd.f32 %v153_v27, %v131_v28  ;;  %v205_v30 = vpop.f32.mrb[1].mxu0 }
 0x11f   :  { %v135_v31 = vmax.f32 %v132_v29, 0.0 }
 0x121   :  { %136 = vst [vmem:[#allocation7] sm:$0xff] %v135_v31 }
 0x122   :  { %293 = shalt.err (!%p290_p6)
}
 0x123   :  { %s294_s16 = scalar_lea.hbm %s387_s3, 128 }
 0x124   :  { %p295_p7 = scmp.ne.s32.totalorder %s387_s3, %s294_s16  ;;  %p298_p8 = scmp.lt.u32.totalorder %s294_s16, %s387_s3 }
 0x126   :  { %p300_p9 = pnand %p298_p8, %p295_p7 }
 0x128   :  { %303 = shalt.err (!%p300_p9)
}
 0x129   :  { %146 = dma.vmem_to_hbm [thread:$0]  %s144_s12, 128, %s387_s3, [#allocation4]  }
 0x12a   :  { %308 = dma.done.wait [#allocation4], 128  }
 0x12b   :  { %309 = vsyncadd [#allocation4], 4294967168 }
 0x12c   :  { %150 = vsyncpa [#allocation3], 1 }
 0x12d   :  { %151 = vsyncpa [#allocation6], 1 }
 0x12e   :  { %152 = vsyncpa [#allocation4], 1 }

</bundles_post_ra>
